<compile_context>
chip_gen: v7x
topology: tpu7x:2x2x1
jax: 0.10.0
libtpu: 0.0.40
codegen_flags: <defaults>
</compile_context>

<pallas_src>
import functools

import jax
import jax.numpy as jnp
from jax.experimental import pallas as pl
from jax.experimental.pallas import tpu as pltpu


def _pair(v):
    return (v, v) if isinstance(v, int) else tuple(v)


def _round_up(a, b):
    return (a + b - 1) // b * b


# ----------------------------- Pallas kernels ------------------------------ #

def _conv_stats_kernel(taps_ref, w_ref, y_ref, sum_ref, sumsq_ref):
    """One GEMM per (group, M-tile): y = W @ taps, plus per-tile BN partials.

    taps_ref: (1, Kp, tm)   w_ref: (1, Cg, Kp)   y_ref: (1, Cg, tm)
    sum_ref / sumsq_ref: (1, Cg, 128) per-tile partial sums (lane replicated).
    """
    acc = jnp.dot(w_ref[0], taps_ref[0], preferred_element_type=jnp.float32)
    y_ref[0, :, :] = acc.astype(y_ref.dtype)
    s = jnp.sum(acc, axis=1, keepdims=True)           # (Cg, 1)
    ss = jnp.sum(acc * acc, axis=1, keepdims=True)    # (Cg, 1)
    sum_ref[0, :, :] = jnp.broadcast_to(s, sum_ref.shape[1:])
    sumsq_ref[0, :, :] = jnp.broadcast_to(ss, sumsq_ref.shape[1:])


def _conv_bias_kernel(taps_ref, w_ref, b_ref, y_ref):
    """One GEMM per (group, M-tile) with per-channel bias (no-BN path)."""
    acc = jnp.dot(w_ref[0], taps_ref[0], preferred_element_type=jnp.float32)
    acc = acc + b_ref[0]                              # (Cg, 1) sublane broadcast
    y_ref[0, :, :] = acc.astype(y_ref.dtype)


def _bn_prelu_kernel(y_ref, scale_ref, shift_ref, alpha_ref, o_ref):
    """z = y*scale + shift ; out = z if z>=0 else alpha*z   (per channel)."""
    z = y_ref[0] * scale_ref[0] + shift_ref[0]
    o_ref[0, :, :] = jnp.where(z >= 0, z, alpha_ref[0] * z)


# ------------------------------- Wrapper ----------------------------------- #

def conv_forward(x, weight, bias, bn_gamma, bn_beta, prelu_alpha, *,
                 stride, padding, dilation=(1, 1), groups=1,
                 bn_acti=False, eps=1e-3, compute_dtype=jnp.float32):
    """Forward pass matching the PyTorch `Conv` module.

    x:       [N, Cin, H, W]  (NCHW, float32)
    weight:  [Cout, Cin//groups, KH, KW]
    bias:    [Cout] or None
    returns: [N, Cout, Ho, Wo]  (NCHW, float32)
    """
    sh, sw = _pair(stride)
    ph, pw = _pair(padding)
    dh, dw = _pair(dilation)

    N, Cin, H, W = x.shape
    Cout, Cin_g, KH, KW = weight.shape
    assert Cin_g * groups == Cin and Cout % groups == 0
    Cout_g = Cout // groups
    T = KH * KW

    Ho = (H + 2 * ph - dh * (KH - 1) - 1) // sh + 1
    Wo = (W + 2 * pw - dw * (KW - 1) - 1) // sw + 1
    M = N * Ho * Wo

    K = T * Cin_g
    Kp = _round_up(K, 8)            # reduction dim (sublanes of the taps block)
    Cg = _round_up(Cout_g, 8)       # per-group out channels (sublanes of y)

    in_bytes = jnp.dtype(compute_dtype).itemsize

    # M tile: big (to amortize ~0.35us/step overhead), multiple of 128 (lane
    # dense), capped so double-buffered tiles stay far below the scoped VMEM
    # limit on every chip generation (v7x has only 64 MiB physical VMEM).
    def _tile_bytes(t):
        return 2 * (Kp * t * in_bytes + 2 * Cg * t * 4
                    + 2 * Cg * 128 * 4 + Cg * Kp * in_bytes)

    tm = 1024
    while tm > 128 and _tile_bytes(tm) > 16 * 1024 * 1024:
        tm //= 2
    tm = min(tm, max(128, _round_up(M, 128)))
    Mp = _round_up(M, tm)
    ntiles = Mp // tm

    # ---------- im2col taps, laid out [G, Kp, Mp] (lane-dense M last) ------- #
    x_nhwc = jnp.transpose(x.astype(jnp.float32), (0, 2, 3, 1))
    x_pad = jnp.pad(x_nhwc, ((0, 0), (ph, ph), (pw, pw), (0, 0)))
    Hp, Wp = x_pad.shape[1], x_pad.shape[2]
    xg = x_pad.reshape(N, Hp, Wp, groups, Cin_g)

    slices = []
    for kh in range(KH):
        for kw in range(KW):
            sl = xg[:, kh * dh: kh * dh + (Ho - 1) * sh + 1: sh,
                    kw * dw: kw * dw + (Wo - 1) * sw + 1: sw, :, :]
            slices.append(sl)                           # [N, Ho, Wo, G, Cin_g]
    taps = jnp.stack(slices, axis=0)                    # [T, N, Ho, Wo, G, Cin_g]
    taps = jnp.transpose(taps, (4, 0, 5, 1, 2, 3))      # [G, T, Cin_g, N, Ho, Wo]
    taps = taps.reshape(groups, K, M)
    taps = jnp.pad(taps, ((0, 0), (0, Kp - K), (0, Mp - M))).astype(compute_dtype)
    # TODO(synk): for very large inputs the im2col materialization could be
    # avoided entirely by slicing the padded NHWC input per (kh,kw) in-kernel.

    # weights: [Cout, Cin_g, KH, KW] -> [G, Cg, Kp]  (same (kh, kw, cin) K order)
    w = weight.astype(jnp.float32).reshape(groups, Cout_g, Cin_g, KH, KW)
    w = jnp.transpose(w, (0, 1, 3, 4, 2)).reshape(groups, Cout_g, K)
    w = jnp.pad(w, ((0, 0), (0, Cg - Cout_g), (0, Kp - K))).astype(compute_dtype)

    def _per_chan(v):                                   # [Cout] -> [G, Cg, 1]
        v = v.astype(jnp.float32).reshape(groups, Cout_g)
        v = jnp.pad(v, ((0, 0), (0, Cg - Cout_g)))
        return v.reshape(groups, Cg, 1)

    grid = (groups, ntiles)
    y_block = pl.BlockSpec((1, Cg, tm), lambda g, i: (g, 0, i))
    taps_block = pl.BlockSpec((1, Kp, tm), lambda g, i: (g, 0, i))
    w_block = pl.BlockSpec((1, Cg, Kp), lambda g, i: (g, 0, 0))
    chan_block = pl.BlockSpec((1, Cg, 1), lambda g, i: (g, 0, 0))
    stat_block = pl.BlockSpec((1, Cg, 128), lambda g, i: (g, 0, i))
    parallel = pltpu.CompilerParams(
        dimension_semantics=("parallel", "parallel"))

    if bn_acti:
        # Conv bias (if any) is dropped: BatchNorm is invariant to a constant
        # per-channel offset, so the final output is unchanged.
        y, psum, psumsq = pl.pallas_call(
            _conv_stats_kernel,
            out_shape=(
                jax.ShapeDtypeStruct((groups, Cg, Mp), jnp.float32),
                jax.ShapeDtypeStruct((groups, Cg, ntiles * 128), jnp.float32),
                jax.ShapeDtypeStruct((groups, Cg, ntiles * 128), jnp.float32),
            ),
            grid_spec=pltpu.PrefetchScalarGridSpec(
                num_scalar_prefetch=0,
                grid=grid,
                in_specs=[taps_block, w_block],
                out_specs=(y_block, stat_block, stat_block),
            ),
            compiler_params=parallel,
        )(taps, w)

        # Finalize training-mode BN statistics (tiny [G, Cg] per-channel math).
        tot_sum = psum.reshape(groups, Cg, ntiles, 128)[..., 0].sum(axis=2)
        tot_sumsq = psumsq.reshape(groups, Cg, ntiles, 128)[..., 0].sum(axis=2)
        mean = tot_sum / M
        var = jnp.maximum(tot_sumsq / M - mean * mean, 0.0)  # clamp >= 0
        gamma = _per_chan(bn_gamma)[..., 0]
        beta = _per_chan(bn_beta)[..., 0]
        scale = (gamma / jnp.sqrt(var + eps)).reshape(groups, Cg, 1)
        shift = (beta - mean * scale[..., 0]).reshape(groups, Cg, 1)
        alpha = _per_chan(prelu_alpha)

        y = pl.pallas_call(
            _bn_prelu_kernel,
            out_shape=jax.ShapeDtypeStruct((groups, Cg, Mp), jnp.float32),
            grid_spec=pltpu.PrefetchScalarGridSpec(
                num_scalar_prefetch=0,
                grid=grid,
                in_specs=[y_block, chan_block, chan_block, chan_block],
                out_specs=y_block,
            ),
            compiler_params=parallel,
        )(y, scale, shift, alpha)
        # TODO(synk): eval-mode BatchNorm (running statistics) is not
        # implemented; module default behavior (train-mode batch stats) is.
    else:
        b = jnp.zeros((groups, Cg, 1), jnp.float32) if bias is None else _per_chan(bias)
        y = pl.pallas_call(
            _conv_bias_kernel,
            out_shape=jax.ShapeDtypeStruct((groups, Cg, Mp), jnp.float32),
            grid_spec=pltpu.PrefetchScalarGridSpec(
                num_scalar_prefetch=0,
                grid=grid,
                in_specs=[taps_block, w_block, chan_block],
                out_specs=y_block,
            ),
            compiler_params=parallel,
        )(taps, w, b)

    # [G, Cg, Mp] -> slice off channel/M padding -> NCHW
    y = y[:, :Cout_g, :M].reshape(Cout, N, Ho, Wo)
    return jnp.transpose(y, (1, 0, 2, 3))


# ------------------------------ Reference ---------------------------------- #

def reference_forward(x, weight, bias, bn_gamma, bn_beta, prelu_alpha, *,
                      stride, padding, dilation, groups, bn_acti, eps):
    sh, sw = _pair(stride); ph, pw = _pair(padding); dh, dw = _pair(dilation)
    y = jax.lax.conv_general_dilated(
        x, weight, window_strides=(sh, sw), padding=[(ph, ph), (pw, pw)],
        rhs_dilation=(dh, dw), dimension_numbers=("NCHW", "OIHW", "NCHW"),
        feature_group_count=groups)
    if bias is not None:
        y = y + bias.reshape(1, -1, 1, 1)
    if bn_acti:
        mean = y.mean(axis=(0, 2, 3), keepdims=True)
        var = ((y - mean) ** 2).mean(axis=(0, 2, 3), keepdims=True)
        z = (y - mean) / jnp.sqrt(var + eps)
        z = z * bn_gamma.reshape(1, -1, 1, 1) + bn_beta.reshape(1, -1, 1, 1)
        a = prelu_alpha.reshape(1, -1, 1, 1)
        y = jnp.where(z >= 0, z, a * z)
    return y


# --------------------------------- Main ------------------------------------ #

if __name__ == "__main__":
    key = jax.random.PRNGKey(0)

    # Case 1: Conv(nIn=4, nOut=8, kSize=3, stride=1, padding=1,
    #              bn_acti=True, bias=False)
    nIn, nOut, k = 4, 8, 3
    N, H, W = 2, 16, 16
    k1, k2, k3 = jax.random.split(key, 3)
    x = jax.random.normal(k1, (N, nIn, H, W), jnp.float32)
    w1 = jax.random.normal(k2, (nOut, nIn, k, k), jnp.float32) * 0.1
    gamma = jnp.ones((nOut,), jnp.float32)      # BatchNorm2d default init
    beta = jnp.zeros((nOut,), jnp.float32)
    alpha = jnp.full((nOut,), 0.25, jnp.float32)  # nn.PReLU default init

    run1 = functools.partial(conv_forward, stride=1, padding=1, dilation=(1, 1),
                             groups=1, bn_acti=True, eps=1e-3)
    out1 = jax.block_until_ready(run1(x, w1, None, gamma, beta, alpha))
    ref1 = reference_forward(x, w1, None, gamma, beta, alpha,
                             stride=1, padding=1, dilation=(1, 1), groups=1,
                             bn_acti=True, eps=1e-3)
    assert out1.shape == ref1.shape == (N, nOut, H, W)
    assert jnp.allclose(out1, ref1, atol=2e-3, rtol=2e-3), \
        float(jnp.max(jnp.abs(out1 - ref1)))

    # Case 2: grouped conv, stride 2, bias, no BN/PReLU (exercises the bias
    # kernel and the multi-group grid axis).
    groups2 = 2
    k4, k5 = jax.random.split(k3)
    w2 = jax.random.normal(k4, (nOut, nIn // groups2, k, k), jnp.float32) * 0.1
    b2 = jax.random.normal(k5, (nOut,), jnp.float32) * 0.1
    run2 = functools.partial(conv_forward, stride=2, padding=1, dilation=(1, 1),
                             groups=groups2, bn_acti=False, eps=1e-3)
    out2 = jax.block_until_ready(run2(x, w2, b2, gamma, beta, alpha))
    ref2 = reference_forward(x, w2, b2, gamma, beta, alpha,
                             stride=2, padding=1, dilation=(1, 1),
                             groups=groups2, bn_acti=False, eps=1e-3)
    assert out2.shape == ref2.shape == (N, nOut, H // 2, W // 2)
    assert jnp.allclose(out2, ref2, atol=2e-3, rtol=2e-3), \
        float(jnp.max(jnp.abs(out2 - ref2)))

    print("KERNEL_OK")
</pallas_src>

<mosaic_0001>
module attributes {stable_mosaic.version = 11 : i64} {
  func.func @_conv_stats_kernel(%arg0: i32, %arg1: i32, %arg2: memref<1x40x512xf32, #tpu.memory_space<vmem>>, %arg3: memref<1x8x40xf32, #tpu.memory_space<vmem>>, %arg4: memref<1x8x512xf32, #tpu.memory_space<vmem>>, %arg5: memref<1x8x128xf32, #tpu.memory_space<vmem>>, %arg6: memref<1x8x128xf32, #tpu.memory_space<vmem>>) attributes {dimension_semantics = [#tpu.dimension_semantics<parallel>, #tpu.dimension_semantics<parallel>], iteration_bounds = array<i64: 1, 1>, scalar_prefetch = 0 : i64, scratch_operands = 0 : i64, tpu.core_type = #tpu.core_type<tc>, window_params = [{transform_indices = @transform_0, window_bounds = array<i64: 1, 40, 512>}, {transform_indices = @transform_1, window_bounds = array<i64: 1, 8, 40>}, {transform_indices = @transform_2, window_bounds = array<i64: 1, 8, 512>}, {transform_indices = @transform_3, window_bounds = array<i64: 1, 8, 128>}, {transform_indices = @transform_4, window_bounds = array<i64: 1, 8, 128>}]} {
    %c0 = arith.constant 0 : index
    %c0_0 = arith.constant 0 : index
    %c0_1 = arith.constant 0 : index
    %0 = vector.load %arg3[%c0, %c0_0, %c0_1] : memref<1x8x40xf32, #tpu.memory_space<vmem>>, vector<1x8x40xf32>
    %1 = vector.shape_cast %0 : vector<1x8x40xf32> to vector<8x40xf32>
    %c0_2 = arith.constant 0 : index
    %c0_3 = arith.constant 0 : index
    %c0_4 = arith.constant 0 : index
    %2 = vector.load %arg2[%c0_2, %c0_3, %c0_4] : memref<1x40x512xf32, #tpu.memory_space<vmem>>, vector<1x40x512xf32>
    %3 = vector.shape_cast %2 : vector<1x40x512xf32> to vector<40x512xf32>
    %cst = arith.constant dense<0.000000e+00> : vector<8x512xf32>
    %4 = tpu.matmul %1, %3, %cst {dimension_numbers = #tpu.dot_dimension_numbers<[1], [0], [0], [1], [0, 0, 1, 1], [], []>} : vector<8x40xf32>, vector<40x512xf32>, vector<8x512xf32> -> vector<8x512xf32>
    %c0_5 = arith.constant 0 : index
    %c0_6 = arith.constant 0 : index
    %c0_7 = arith.constant 0 : index
    %5 = vector.load %arg4[%c0_5, %c0_6, %c0_7] : memref<1x8x512xf32, #tpu.memory_space<vmem>>, vector<1x8x512xf32>
    %6 = vector.shape_cast %5 : vector<1x8x512xf32> to vector<8x512xf32>
    %7 = vector.shape_cast %4 : vector<8x512xf32> to vector<1x8x512xf32>
    tpu.vector_store %arg4[%c0_5, %c0_6, %c0_7], %7 {strides = array<i32>} : memref<1x8x512xf32, #tpu.memory_space<vmem>>, vector<1x8x512xf32>,
    %cst_8 = arith.constant dense<0.000000e+00> : vector<8xf32>
    %8 = vector.multi_reduction <add>, %4, %cst_8 [1] : vector<8x512xf32> to vector<8xf32>
    %9 = vector.shape_cast %8 : vector<8xf32> to vector<8x1xf32>
    %10 = arith.mulf %4, %4 : vector<8x512xf32>
    %cst_9 = arith.constant dense<0.000000e+00> : vector<8xf32>
    %11 = vector.multi_reduction <add>, %10, %cst_9 [1] : vector<8x512xf32> to vector<8xf32>
    %12 = vector.shape_cast %11 : vector<8xf32> to vector<8x1xf32>
    %13 = vector.shape_cast %9 : vector<8x1xf32> to vector<8x1xf32>
    %14 = vector.broadcast %13 : vector<8x1xf32> to vector<8x128xf32>
    %c0_10 = arith.constant 0 : index
    %c0_11 = arith.constant 0 : index
    %c0_12 = arith.constant 0 : index
    %15 = vector.load %arg5[%c0_10, %c0_11, %c0_12] : memref<1x8x128xf32, #tpu.memory_space<vmem>>, vector<1x8x128xf32>
    %16 = vector.shape_cast %15 : vector<1x8x128xf32> to vector<8x128xf32>
    %17 = vector.shape_cast %14 : vector<8x128xf32> to vector<1x8x128xf32>
    tpu.vector_store %arg5[%c0_10, %c0_11, %c0_12], %17 {strides = array<i32>} : memref<1x8x128xf32, #tpu.memory_space<vmem>>, vector<1x8x128xf32>,
    %18 = vector.shape_cast %12 : vector<8x1xf32> to vector<8x1xf32>
    %19 = vector.broadcast %18 : vector<8x1xf32> to vector<8x128xf32>
    %c0_13 = arith.constant 0 : index
    %c0_14 = arith.constant 0 : index
    %c0_15 = arith.constant 0 : index
    %20 = vector.load %arg6[%c0_13, %c0_14, %c0_15] : memref<1x8x128xf32, #tpu.memory_space<vmem>>, vector<1x8x128xf32>
    %21 = vector.shape_cast %20 : vector<1x8x128xf32> to vector<8x128xf32>
    %22 = vector.shape_cast %19 : vector<8x128xf32> to vector<1x8x128xf32>
    tpu.vector_store %arg6[%c0_13, %c0_14, %c0_15], %22 {strides = array<i32>} : memref<1x8x128xf32, #tpu.memory_space<vmem>>, vector<1x8x128xf32>,
    return
  }
  func.func @transform_0(%arg0: i32, %arg1: i32) -> (i32, i32, i32) {
    %c0_i32 = arith.constant 0 : i32
    %c0_i32_0 = arith.constant 0 : i32
    return %arg0, %c0_i32, %arg1 : i32, i32, i32
  }
  func.func @transform_1(%arg0: i32, %arg1: i32) -> (i32, i32, i32) {
    %c0_i32 = arith.constant 0 : i32
    %c0_i32_0 = arith.constant 0 : i32
    %c0_i32_1 = arith.constant 0 : i32
    return %arg0, %c0_i32, %c0_i32_0 : i32, i32, i32
  }
  func.func @transform_2(%arg0: i32, %arg1: i32) -> (i32, i32, i32) {
    %c0_i32 = arith.constant 0 : i32
    %c0_i32_0 = arith.constant 0 : i32
    return %arg0, %c0_i32, %arg1 : i32, i32, i32
  }
  func.func @transform_3(%arg0: i32, %arg1: i32) -> (i32, i32, i32) {
    %c0_i32 = arith.constant 0 : i32
    %c0_i32_0 = arith.constant 0 : i32
    return %arg0, %c0_i32, %arg1 : i32, i32, i32
  }
  func.func @transform_4(%arg0: i32, %arg1: i32) -> (i32, i32, i32) {
    %c0_i32 = arith.constant 0 : i32
    %c0_i32_0 = arith.constant 0 : i32
    return %arg0, %c0_i32, %arg1 : i32, i32, i32
  }
}

</mosaic_0001>

<bundles_post_ra>
// kernel: tpu_custom_call.1
= control target key start
LH: loop header
LB: loop body
LE: loop exit
PB: predicated region body
PF: predicated region fallthrough
CT: control target
= control target key end

     0   :  { %10 = vsyncpa [#allocation3], 0  ;;  %s509_s0 = inlined_call_operand.hbm [shape: f32[1,40,512], index: 0, kind: input, shape index: {}]   ;;  %s510_s1 = inlined_call_operand.hbm [shape: f32[1,8,40], index: 1, kind: input, shape index: {}]   ;;  %s511_s2 = inlined_call_operand.hbm [shape: f32[1,8,512], index: 2, kind: output, shape index: {0}]   ;;  %s512_s3 = inlined_call_operand.hbm [shape: f32[1,8,128], index: 3, kind: output, shape index: {1}]   ;;  %s513_s4 = inlined_call_operand.hbm [shape: f32[1,8,128], index: 4, kind: output, shape index: {2}]  }
   0x1   :  { %11 = vsyncpa [#allocation6], 0 }
   0x2   :  { %12 = vsyncpa [#allocation4], 0 }
   0x3   :  { %13 = vsyncpa [#allocation9], 0  ;;  %s416_s15 = smov [#allocation2]   ;;  %s298_s19 = scalar_lea.hbm %s509_s0, 2560 }
   0x4   :  { %s19_s16 = sshll.u32 %s416_s15, 4  ;;  %p299_p0 = scmp.ne.s32.totalorder %s509_s0, %s298_s19  ;;  %s20_s16 = int_to_ptr.vmem [resolvable:$true] %s19_s16 }
   0x5   :  { %p302_p1 = scmp.lt.u32.totalorder %s298_s19, %s509_s0 }
   0x7   :  { %p304_p2 = pnand %p302_p1, %p299_p0 }
   0x9   :  { %307 = shalt.err (!%p304_p2)
}
   0xa   :  { %s308_s24 = scalar_lea.vmem %s20_s16, 2560  ;;  %p313_p4 = scmp.lt.s32.totalorder %s20_s16, %s20_s16 }
   0xb   :  { %p309_p3 = scmp.ne.s32.totalorder %s20_s16, %s308_s24  ;;  %p314_p5 = scmp.lt.s32.totalorder %s308_s24, %s308_s24 }
   0xd   :  { %p315_p6 = por %p314_p5, %p313_p4 }
   0xf   :  { %p316_p7 = pnand %p315_p6, %p309_p3 }
  0x11   :  { %319 = shalt.err (!%p316_p7)
}
  0x12   :  { %s417_s25 = smov 512   ;;  %s418_s26 = smov 32  }
  0x13   :  { %25 = dma.hbm_to_vmem [thread:$0]  %s509_s0, 2560, %s20_s16, [#allocation3], %s417_s25, %s417_s25, %s418_s26  }
  0x14   :  { %s419_s29 = smov [#allocation5]   ;;  %s320_s7 = scalar_lea.hbm %s510_s1, 128 }
  0x15   :  { %s32_s30 = sshll.u32 %s419_s29, 4  ;;  %p321_p8 = scmp.ne.s32.totalorder %s510_s1, %s320_s7  ;;  %s33_s30 = int_to_ptr.vmem [resolvable:$true] %s32_s30 }
  0x16   :  { %p324_p9 = scmp.lt.u32.totalorder %s320_s7, %s510_s1 }
  0x18   :  { %p326_p10 = pnand %p324_p9, %p321_p8 }
  0x1a   :  { %329 = shalt.err (!%p326_p10)
}
  0x1b   :  { %s330_s12 = scalar_lea.vmem %s33_s30, 128  ;;  %p335_p12 = scmp.lt.s32.totalorder %s33_s30, %s33_s30 }
  0x1c   :  { %p331_p11 = scmp.ne.s32.totalorder %s33_s30, %s330_s12  ;;  %p336_p13 = scmp.lt.s32.totalorder %s330_s12, %s330_s12 }
  0x1e   :  { %p337_p0 = por %p336_p13, %p335_p12 }
  0x20   :  { %p338_p1 = pnand %p337_p0, %p331_p11 }
  0x22   :  { %341 = shalt.err (!%p338_p1)
}
  0x23   :  { %35 = dma.hbm_to_vmem [thread:$0]  %s510_s1, 128, %s33_s30, [#allocation6]  }
  0x24   :  { %408 = dma.done.wait [#allocation3], 2560  }
  0x25   :  { %409 = vsyncadd [#allocation3], 4294964736 }
  0x26   :  { %410 = dma.done.wait [#allocation6], 128  }
  0x27   :  { %411 = vsyncadd [#allocation6], 4294967168  ;;  %v420_v0 = vmov 0.0   ;;  %v44_v1 = vld [vmem:[#allocation2 + $0x8] sm:$0xff]  ;;  %v43_v3 = vld [vmem:[#allocation2] sm:$0xff]  ;;  %vm63_vm0 = vcmask 326656  }
  0x28   :  { %131 = vmatprep.mubr.f32.mxu0 %v420_v0  ;;  %202 = vmatprep.mubr.f32.mxu1 %v420_v0  ;;  %v48_v2 = vld [vmem:[#allocation2 + $0x28] sm:$0xff]  ;;  %v47_v5 = vld [vmem:[#allocation2 + $0x20] sm:$0xff]  ;;  %v46_v6 = vld [vmem:[#allocation2 + $0x18] sm:$0xff]  ;;  %s421_s1 = smov [#allocation7]  }
  0x29   :  { %v274_v4 = vpack.c.bf16 %v48_v2, %v44_v1  ;;  %v50_v7 = vld [vmem:[#allocation2 + $0x38] sm:$0xff]  ;;  %v276_v8 = vpack.c.bf16 %v47_v5, %v43_v3  ;;  %v45_v10 = vld [vmem:[#allocation2 + $0x10] sm:$0xff]  ;;  %v52_v12 = vld [vmem:[#allocation2 + $0x48] sm:$0xff]  ;;  %s235_s14 = sshll.u32 %s421_s1, 4  ;;  %s236_s14 = int_to_ptr.vmem [resolvable:$true] %s235_s14 }
  0x2a   :  { %v282_v9 = vpack.c.bf16 %v50_v7, %v46_v6  ;;  %v49_v11 = vld [vmem:[#allocation2 + $0x30] sm:$0xff]  ;;  %v56_v14 = vld [vmem:[#allocation2 + $0x68] sm:$0xff]  ;;  %v51_v15 = vld [vmem:[#allocation2 + $0x40] sm:$0xff]  ;;  %s342_s15 = scalar_lea.vmem %s236_s14, 512  ;;  %p347_p3 = scmp.lt.s32.totalorder %s236_s14, %s236_s14 }
  0x2b   :  { %275 = vmatprep.subr.bf16.mxu0 %v274_v4  ;;  %v284_v13 = vpack.c.bf16 %v49_v11, %v45_v10  ;;  %v55_v16 = vld [vmem:[#allocation2 + $0x60] sm:$0xff]  ;;  %v278_v17 = vpack.c.bf16 %v56_v14, %v52_v12  ;;  %v54_v19 = vld [vmem:[#allocation2 + $0x58] sm:$0xff]  ;;  %v53_v21 = vld [vmem:[#allocation2 + $0x50] sm:$0xff]  ;;  %p343_p2 = scmp.ne.s32.totalorder %s236_s14, %s342_s15  ;;  %p348_p4 = scmp.lt.s32.totalorder %s342_s15, %s342_s15 }
  0x2c   :  { %277 = vmatpush1.bf16.msra.mxu0 %v276_v8  ;;  %283 = vmatprep.subr.bf16.mxu1 %v282_v9  ;;  %v280_v18 = vpack.c.bf16 %v55_v16, %v51_v15  ;;  %v58_v20 = vld [vmem:[#allocation2 + $0x78] sm:$0xff]  ;;  %v57_v23 = vld [vmem:[#allocation2 + $0x70] sm:$0xff]  ;;  %v60_v25 = vld [vmem:[#allocation2 + $0x88] sm:$0xff] }
  0x2d   :  { %285 = vmatpush1.bf16.msra.mxu1 %v284_v13  ;;  %v286_v22 = vpack.c.bf16 %v58_v20, %v54_v19  ;;  %279 = vmatprep.subr.bf16.mxu0 %v278_v17  ;;  %v288_v24 = vpack.c.bf16 %v57_v23, %v53_v21  ;;  %v62_v26 = vld [vmem:[#allocation2 + $0x98] sm:$0xff]  ;;  %v59_v27 = vld [vmem:[#allocation2 + $0x80] sm:$0xff]  ;;  %v61_v29 = vld [vmem:[#allocation2 + $0x90] sm:$0xff]  ;;  %p349_p5 = por %p348_p4, %p347_p3 }
  0x2e   :  { %v42_v28 = vld [vmem:[#allocation5] sm:$0xff] }
  0x2f   :  { %287 = vmatprep.subr.bf16.mxu1 %v286_v22  ;;  %p350_p6 = pnand %p349_p5, %p343_p2 }
  0x30   :  { %281 = vmatpush1.bf16.msra.mxu0 %v280_v18 }
  0x31   :  { %289 = vmatpush1.bf16.msra.mxu1 %v288_v24  ;;  %75 = vmatprep.subr.mxu0 %v60_v25 }
  0x32   :  { %146 = vmatprep.subr.mxu1 %v62_v26 }
  0x34   :  { %76 = vmatpush1.msra.mxu0 %v59_v27 }
  0x35   :  { %272 = vmatmul.mubr.msk.f32.vlgmr.msra.gmra.mrb[0].mxu0 %vm63_vm0, %v42_v28  ;;  %147 = vmatpush1.msra.mxu1 %v61_v29 }
  0x36   :  { %273 = vmatmul.mubr.msk.f32.vlgmr.msra.gmra.mrb[0].mxu1 %vm63_vm0, %v42_v28 }
 0x108   :  { %v133_v30 = vpop.f32.mrb[0].mxu0 }
 0x109   :  { %209 = vst [vmem:[#allocation7] sm:$0xff] %v133_v30  ;;  %v218_v31 = vmul.f32 %v133_v30, %v133_v30  ;;  %v135_v32 = vpop.f32.mrb[1].mxu0  ;;  %v204_v33 = vpop.f32.mrb[0].mxu1 }
 0x10a   :  { %210 = vst [vmem:[#allocation7 + $0x8] sm:$0xff] %v135_v32  ;;  %v213_v34 = vadd.f32 %v135_v32, %v133_v30  ;;  %v219_v35 = vmul.f32 %v135_v32, %v135_v32  ;;  %211 = vst [vmem:[#allocation7 + $0x10] sm:$0xff] %v204_v33  ;;  %v220_v36 = vmul.f32 %v204_v33, %v204_v33  ;;  %v206_v37 = vpop.f32.mrb[1].mxu1 }
 0x10b   :  { %212 = vst [vmem:[#allocation7 + $0x18] sm:$0xff] %v206_v37  ;;  %v221_v40 = vmul.f32 %v206_v37, %v206_v37 }
 0x10c   :  { %v222_v38 = vadd.f32 %v219_v35, %v218_v31  ;;  %v214_v39 = vadd.f32 %v213_v34, %v204_v33 }
 0x10e   :  { %v215_v41 = vadd.f32 %v214_v39, %v206_v37  ;;  %v223_v42 = vadd.f32 %v222_v38, %v220_v36 }
 0x110   :  { %216 = vadd.xlane.f32.xlu0 %v215_v41  ;;  %v224_v43 = vadd.f32 %v223_v42, %v221_v40 }
 0x114   :  { %225 = vadd.xlane.f32.xlu0 %v224_v43 }
 0x115   :  { %353 = shalt.err (!%p350_p6)
}
 0x116   :  { %s354_s18 = scalar_lea.hbm %s511_s2, 512 }
 0x117   :  { %p355_p7 = scmp.ne.s32.totalorder %s511_s2, %s354_s18  ;;  %p358_p8 = scmp.lt.u32.totalorder %s354_s18, %s511_s2 }
 0x119   :  { %p360_p9 = pnand %p358_p8, %p355_p7 }
 0x11b   :  { %363 = shalt.err (!%p360_p9)
}
 0x11c   :  { %238 = dma.vmem_to_hbm [thread:$0]  %s236_s14, 512, %s511_s2, [#allocation4]  }
 0x11d   :  { %s422_s25 = smov [#allocation8]   ;;  %s423_s27 = smov [#allocation10]  }
 0x11e   :  { %s245_s26 = sshll.u32 %s422_s25, 4  ;;  %s255_s28 = sshll.u32 %s423_s27, 4  ;;  %s246_s26 = int_to_ptr.vmem [resolvable:$true] %s245_s26  ;;  %s256_s28 = int_to_ptr.vmem [resolvable:$true] %s255_s28 }
 0x11f   :  { %s364_s29 = scalar_lea.vmem %s246_s26, 128  ;;  %p369_p11 = scmp.lt.s32.totalorder %s246_s26, %s246_s26 }
 0x120   :  { %p365_p10 = scmp.ne.s32.totalorder %s246_s26, %s364_s29  ;;  %p370_p12 = scmp.lt.s32.totalorder %s364_s29, %s364_s29 }
 0x122   :  { %p371_p13 = por %p370_p12, %p369_p11 }
 0x124   :  { %p372_p0 = pnand %p371_p13, %p365_p10 }
 0x19d   :  { %v217_v44 = vpop.xlane.xlu0 %216 }
 0x19e   :  { %227 = vst [vmem:[#allocation8] sm:$0xff] %v217_v44 }
 0x19f   :  { %375 = shalt.err (!%p372_p0)
}
 0x1a0   :  { %s376_s6 = scalar_lea.hbm %s512_s3, 128 }
 0x1a1   :  { %p377_p1 = scmp.ne.s32.totalorder %s512_s3, %s376_s6  ;;  %p380_p2 = scmp.lt.u32.totalorder %s376_s6, %s512_s3 }
 0x1a3   :  { %p382_p3 = pnand %p380_p2, %p377_p1 }
 0x1a5   :  { %385 = shalt.err (!%p382_p3)
}
 0x1a6   :  { %248 = dma.vmem_to_hbm [thread:$0]  %s246_s26, 128, %s512_s3, [#allocation9]   ;;  %v226_v45 = vpop.xlane.xlu0 %225 }
 0x1a7   :  { %228 = vst [vmem:[#allocation10] sm:$0xff] %v226_v45  ;;  %s386_s12 = scalar_lea.vmem %s256_s28, 128  ;;  %p391_p5 = scmp.lt.s32.totalorder %s256_s28, %s256_s28 }
 0x1a8   :  { %p387_p4 = scmp.ne.s32.totalorder %s256_s28, %s386_s12  ;;  %p392_p6 = scmp.lt.s32.totalorder %s386_s12, %s386_s12 }
 0x1aa   :  { %p393_p7 = por %p392_p6, %p391_p5 }
 0x1ac   :  { %p394_p8 = pnand %p393_p7, %p387_p4 }
 0x1ae   :  { %397 = shalt.err (!%p394_p8)
}
 0x1af   :  { %s398_s1 = scalar_lea.hbm %s513_s4, 128 }
 0x1b0   :  { %p399_p9 = scmp.ne.s32.totalorder %s513_s4, %s398_s1  ;;  %p402_p10 = scmp.lt.u32.totalorder %s398_s1, %s513_s4 }
 0x1b2   :  { %p404_p11 = pnand %p402_p10, %p399_p9 }
 0x1b4   :  { %407 = shalt.err (!%p404_p11)
}
 0x1b5   :  { %258 = dma.vmem_to_hbm [thread:$0]  %s256_s28, 128, %s513_s4, [#allocation9]  }
 0x1b6   :  { %412 = dma.done.wait [#allocation4], 512  }
 0x1b7   :  { %413 = vsyncadd [#allocation4], 4294966784 }
 0x1b8   :  { %414 = dma.done.wait [#allocation9], 256  }
 0x1b9   :  { %415 = vsyncadd [#allocation9], 4294967040 }
 0x1ba   :  { %268 = vsyncpa [#allocation3], 1 }
 0x1bb   :  { %269 = vsyncpa [#allocation6], 1 }
 0x1bc   :  { %270 = vsyncpa [#allocation4], 1 }
 0x1bd   :  { %271 = vsyncpa [#allocation9], 1 }

</bundles_post_ra>
